<compile_context>
chip_gen: v5e
topology: v5e:2x2
jax: 0.10.0
libtpu: 0.0.40
codegen_flags: <defaults>
</compile_context>

<pallas_src>
import jax
import jax.numpy as jnp
import numpy as np
from jax.experimental import pallas as pl
from jax.experimental.pallas import tpu as pltpu


def _round_up(x: int, m: int) -> int:
    return (x + m - 1) // m * m


def _cdiv(a: int, b: int) -> int:
    return -(-a // b)


# ---------------------------------------------------------------------------
# Kernel: one (tm, K0) @ (K0, N0) MXU matmul + bias, single store per tile.
# ---------------------------------------------------------------------------
def _patch_embed_kernel(a_ref, w_ref, b_ref, o_ref):
    o_ref[...] = (
        jnp.dot(a_ref[...], w_ref[...], preferred_element_type=jnp.float32)
        + b_ref[...]
    ).astype(o_ref.dtype)


def _pick_tiles(M: int, K0: int, N0: int):
    """1-D grid over M; W/bias resident; A (bf16) and out (f32) double-buffered."""
    vmem_budget = 24 * 1024 * 1024
    resident = K0 * N0 * 2 + N0 * 4                 # W bf16 + bias f32
    per_row = 2 * (K0 * 2) + 2 * (N0 * 4)           # 2 bufs A bf16 + 2 bufs out f32
    tm_cap = max(8, ((vmem_budget - resident) // max(per_row, 1)) // 8 * 8)
    tm_target = max(8, min(1024, tm_cap))
    grid_m = _cdiv(M, tm_target)
    if M >= 256:
        # Enough rows: make sure there are >= 2 M-shards so v7x's two
        # TensorCores both get work (harmless on single-TC v5e / v6e).
        grid_m = max(grid_m, 2)
    tm = _round_up(_cdiv(M, grid_m), 8)
    return grid_m, tm


# ---------------------------------------------------------------------------
# Forward wrapper
# ---------------------------------------------------------------------------
def _patch_embedding_forward_impl(x, weight, bias, *, patch_size: int):
    """PatchEmbedding.forward.

    x:      (B, C, H, W)
    weight: (E, C, P, P)  Conv2d weight, OIHW
    bias:   (E,)
    returns (B, num_patches, E) float32
    """
    B, C, H, W = x.shape
    E = weight.shape[0]
    P = patch_size
    Hn, Wn = H // P, W // P
    num_patches = Hn * Wn

    # Match Conv2d stride-P semantics when H/W are not exact multiples of P.
    x = x[:, :, : Hn * P, : Wn * P]

    # im2col (pure layout): (B, C, H, W) -> (M, K), K flattened in (c, p, q)
    # order to match OIHW.  bf16 operands for the MXU; bias stays f32.
    patches = x.reshape(B, C, Hn, P, Wn, P).transpose(0, 2, 4, 1, 3, 5)
    M, K, N = B * num_patches, C * P * P, E
    a = patches.reshape(M, K).astype(jnp.bfloat16)            # (M, K)
    w = weight.reshape(E, K).T.astype(jnp.bfloat16)           # (K, N)
    b = bias.reshape(1, E).astype(jnp.float32)                # (1, N)

    # Lane/sublane-friendly padding. Zero-padded K is mathematically exact;
    # padded M rows / N columns are sliced off afterwards (no-op when aligned).
    K0 = _round_up(K, 128)
    N0 = _round_up(N, 128)
    grid_m, tm = _pick_tiles(M, K0, N0)
    Mp = grid_m * tm

    a_p = jnp.pad(a, ((0, Mp - M), (0, K0 - K))) if (Mp != M or K0 != K) else a
    w_p = jnp.pad(w, ((0, K0 - K), (0, N0 - N))) if (K0 != K or N0 != N) else w
    b_p = jnp.pad(b, ((0, 0), (0, N0 - N))) if N0 != N else b

    out_p = pl.pallas_call(
        _patch_embed_kernel,
        out_shape=jax.ShapeDtypeStruct((Mp, N0), jnp.float32),
        grid=(grid_m,),
        in_specs=[
            pl.BlockSpec((tm, K0), lambda i: (i, 0)),   # A streams over M
            pl.BlockSpec((K0, N0), lambda i: (0, 0)),   # W resident (fetched once)
            pl.BlockSpec((1, N0), lambda i: (0, 0)),    # bias resident
        ],
        out_specs=pl.BlockSpec((tm, N0), lambda i: (i, 0)),
        compiler_params=pltpu.CompilerParams(
            dimension_semantics=("parallel",),
            allow_input_fusion=[True, False, False],
            vmem_limit_bytes=48 * 1024 * 1024,
        ),
        cost_estimate=pl.CostEstimate(
            flops=2 * M * K * N,
            transcendentals=0,
            bytes_accessed=M * K * 2 + K * N * 2 + N * 4 + M * N * 4,
        ),
    )(a_p, w_p, b_p)

    out = out_p
    if Mp != M or N0 != N:
        out = out[:M, :N]
    return out.reshape(B, num_patches, E)


patch_embedding_forward = jax.jit(
    _patch_embedding_forward_impl, static_argnames=("patch_size",)
)


# ---------------------------------------------------------------------------
# Independent reference (XLA conv, f32) & test
# ---------------------------------------------------------------------------
def _reference(x, weight, bias, patch_size):
    y = jax.lax.conv_general_dilated(
        x.astype(jnp.float32),
        weight.astype(jnp.float32),
        window_strides=(patch_size, patch_size),
        padding="VALID",
        dimension_numbers=("NCHW", "OIHW", "NCHW"),
        precision=jax.lax.Precision.HIGHEST,
    )
    y = y + bias.astype(jnp.float32)[None, :, None, None]
    Bb, Ee, Hp, Wp = y.shape
    return y.reshape(Bb, Ee, Hp * Wp).transpose(0, 2, 1)


def _init_params(key, in_channels, embed_dim, patch_size):
    k_w, k_b = jax.random.split(key)
    fan_in = in_channels * patch_size * patch_size
    bound = 1.0 / float(np.sqrt(fan_in))
    weight = jax.random.uniform(
        k_w, (embed_dim, in_channels, patch_size, patch_size),
        dtype=jnp.float32, minval=-bound, maxval=bound)
    bias = jax.random.uniform(
        k_b, (embed_dim,), dtype=jnp.float32, minval=-bound, maxval=bound)
    return weight, bias


if __name__ == "__main__":
    key = jax.random.PRNGKey(0)
    k1, k2, k3, k4 = jax.random.split(key, 4)

    # --- Small case: single grid step, everything resident ------------------
    img_size, patch_size, in_channels, embed_dim, batch = 16, 4, 4, 32, 2
    x = jax.random.normal(k1, (batch, in_channels, img_size, img_size), jnp.float32)
    weight, bias = _init_params(k2, in_channels, embed_dim, patch_size)

    out = patch_embedding_forward(x, weight, bias, patch_size=patch_size)
    out = jax.block_until_ready(out)
    assert out.shape == (batch, (img_size // patch_size) ** 2, embed_dim)

    ref = _reference(x, weight, bias, patch_size)
    np.testing.assert_allclose(np.asarray(out), np.asarray(ref), rtol=2e-2, atol=2e-2)

    # --- Larger case: 1-D grid over M with >= 2 parallel M-tiles ------------
    img_size2, patch_size2, in_channels2, embed_dim2, batch2 = 32, 4, 3, 160, 8
    x2 = jax.random.normal(k3, (batch2, in_channels2, img_size2, img_size2), jnp.float32)
    weight2, bias2 = _init_params(k4, in_channels2, embed_dim2, patch_size2)

    out2 = patch_embedding_forward(x2, weight2, bias2, patch_size=patch_size2)
    out2 = jax.block_until_ready(out2)
    assert out2.shape == (batch2, (img_size2 // patch_size2) ** 2, embed_dim2)

    ref2 = _reference(x2, weight2, bias2, patch_size2)
    np.testing.assert_allclose(np.asarray(out2), np.asarray(ref2), rtol=2e-2, atol=2e-2)

    # TODO(synk): backward pass (conv input/weight grads) not implemented; this
    #             kernel covers PatchEmbedding.forward only.
    print("KERNEL_OK")
</pallas_src>

<mosaic_0001>
module attributes {stable_mosaic.version = 11 : i64} {
  func.func @_patch_embed_kernel(%arg0: i32, %arg1: memref<32x128xbf16, #tpu.memory_space<vmem>>, %arg2: memref<128x128xbf16, #tpu.memory_space<vmem>>, %arg3: memref<1x128xf32, #tpu.memory_space<vmem>>, %arg4: memref<32x128xf32, #tpu.memory_space<vmem>>) attributes {dimension_semantics = [#tpu.dimension_semantics<parallel>], iteration_bounds = array<i64: 1>, scalar_prefetch = 0 : i64, scratch_operands = 0 : i64, tpu.core_type = #tpu.core_type<tc>, window_params = [{transform_indices = @transform_0, window_bounds = array<i64: 32, 128>}, {pipeline_mode = #tpu.pipeline_mode<synchronous>, transform_indices = @transform_1, window_bounds = array<i64: 128, 128>}, {pipeline_mode = #tpu.pipeline_mode<synchronous>, transform_indices = @transform_2, window_bounds = array<i64: 1, 128>}, {transform_indices = @transform_3, window_bounds = array<i64: 32, 128>}]} {
    %c0 = arith.constant 0 : index
    %c0_0 = arith.constant 0 : index
    %0 = vector.load %arg1[%c0, %c0_0] : memref<32x128xbf16, #tpu.memory_space<vmem>>, vector<32x128xbf16>
    %c0_1 = arith.constant 0 : index
    %c0_2 = arith.constant 0 : index
    %1 = vector.load %arg2[%c0_1, %c0_2] : memref<128x128xbf16, #tpu.memory_space<vmem>>, vector<128x128xbf16>
    %cst = arith.constant dense<0.000000e+00> : vector<32x128xf32>
    %2 = tpu.matmul %0, %1, %cst {dimension_numbers = #tpu.dot_dimension_numbers<[1], [0], [0], [1], [0, 0, 1, 1], [], []>} : vector<32x128xbf16>, vector<128x128xbf16>, vector<32x128xf32> -> vector<32x128xf32>
    %c0_3 = arith.constant 0 : index
    %c0_4 = arith.constant 0 : index
    %3 = vector.load %arg3[%c0_3, %c0_4] : memref<1x128xf32, #tpu.memory_space<vmem>>, vector<1x128xf32>
    %4 = vector.broadcast %3 : vector<1x128xf32> to vector<32x128xf32>
    %5 = arith.addf %2, %4 : vector<32x128xf32>
    %c0_5 = arith.constant 0 : index
    %c0_6 = arith.constant 0 : index
    %6 = vector.load %arg4[%c0_5, %c0_6] : memref<32x128xf32, #tpu.memory_space<vmem>>, vector<32x128xf32>
    tpu.vector_store %arg4[%c0_5, %c0_6], %5 {strides = array<i32>} : memref<32x128xf32, #tpu.memory_space<vmem>>, vector<32x128xf32>,
    return
  }
  func.func @transform_0(%arg0: i32) -> (i32, i32) {
    %c0_i32 = arith.constant 0 : i32
    %c0_i32_0 = arith.constant 0 : i32
    return %arg0, %c0_i32 : i32, i32
  }
  func.func @transform_1(%arg0: i32) -> (i32, i32) {
    %c0_i32 = arith.constant 0 : i32
    %c0_i32_0 = arith.constant 0 : i32
    %c0_i32_1 = arith.constant 0 : i32
    return %c0_i32, %c0_i32_0 : i32, i32
  }
  func.func @transform_2(%arg0: i32) -> (i32, i32) {
    %c0_i32 = arith.constant 0 : i32
    %c0_i32_0 = arith.constant 0 : i32
    %c0_i32_1 = arith.constant 0 : i32
    return %c0_i32, %c0_i32_0 : i32, i32
  }
  func.func @transform_3(%arg0: i32) -> (i32, i32) {
    %c0_i32 = arith.constant 0 : i32
    %c0_i32_0 = arith.constant 0 : i32
    return %arg0, %c0_i32 : i32, i32
  }
}

</mosaic_0001>

<bundles_post_ra>
// kernel: _patch_embedding_forward_impl.2
= control target key start
LH: loop header
LB: loop body
LE: loop exit
PB: predicated region body
PF: predicated region fallthrough
CT: control target
= control target key end

     0   :  { %s394_s0 = inlined_call_operand.vmem [shape: bf16[128,128], index: 0, kind: input, shape index: {}]   ;;  %s395_s1 = inlined_call_operand.vmem [shape: f32[1,128], index: 1, kind: input, shape index: {}]   ;;  %s396_s2 = inlined_call_operand.vmem [shape: bf16[32,64], index: 2, kind: input, shape index: {}]   ;;  %s397_s3 = inlined_call_operand.<no memory space> [shape: bf16[], index: 3, kind: input, shape index: {}]   ;;  %s398_s4 = inlined_call_operand.hbm [shape: f32[32,128], index: 4, kind: output, shape index: {}]  }
   0x1   :  { %v9_v0 = vstv %s397_s3 }
   0x2   :  { %v10_v1 = vunpack.i.l.bf16 %v9_v0 }
   0x3   :  { %v288_v2 = vld [vmem:[%s394_s0 + $0x38] sm:$0xff]  ;;  %v33_v3 = vlaneseq  ;;  %v287_v4 = vld [vmem:[%s394_s0 + $0x30] sm:$0xff]  ;;  %v30_v5 = vld [vmem:[%s396_s2] sm:$0xff]  }
   0x4   :  { %195 = vmatpush.bf16.msra.mxu0 %v288_v2  ;;  %289 = vmatpush.bf16.msra.mxu1 %v288_v2  ;;  %v31_v7 = vunpack.c.l.bf16 %v30_v5  ;;  %v53_v8 = vunpack.c.h.bf16 %v30_v5  ;;  %v237_v9 = vld [vmem:[%s396_s2 + $0x8] sm:$0xff]  }
   0x5   :  { %v34_v6 = vand.u32 127, %v33_v3  ;;  %v76_v10 = vunpack.c.l.bf16 %v237_v9  ;;  %v99_v11 = vunpack.c.h.bf16 %v237_v9 }
   0x7   :  { %vm36_vm0 = vcmp.lt.s32.totalorder %v34_v6, 64 }
   0x8   :  { %14 = vsyncpa [#allocation8], 0  ;;  %v37_v12 = vsel %vm36_vm0, %v31_v7, %v10_v1  ;;  %v59_v13 = vsel %vm36_vm0, %v53_v8, %v10_v1  ;;  %196 = vmatpush.bf16.msra.mxu0 %v287_v4  ;;  %290 = vmatpush.bf16.msra.mxu1 %v287_v4  ;;  %v286_v14 = vld [vmem:[%s394_s0 + $0x28] sm:$0xff]  ;;  %v82_v17 = vsel %vm36_vm0, %v76_v10, %v10_v1  ;;  %v285_v21 = vld [vmem:[%s394_s0 + $0x20] sm:$0xff]  ;;  %s327_s11 = smov [#allocation7]   ;;  %s224_s14 = sshll.u32 %s398_s4, 4  ;;  %s225_s14 = int_to_ptr.hbm [resolvable:$true] %s224_s14 }
   0x9   :  { %v38_v15 = vpack.c.bf16 0.0, %v37_v12  ;;  %v61_v16 = vpack.c.bf16 0.0, %v59_v13  ;;  %v105_v18 = vsel %vm36_vm0, %v99_v11, %v10_v1  ;;  %v84_v19 = vpack.c.bf16 0.0, %v82_v17  ;;  %v284_v22 = vld [vmem:[%s394_s0 + $0x18] sm:$0xff]  ;;  %v283_v23 = vld [vmem:[%s394_s0 + $0x10] sm:$0xff]  ;;  %v282_v24 = vld [vmem:[%s394_s0 + $0x8] sm:$0xff] }
   0xa   :  { %v107_v20 = vpack.c.bf16 0.0, %v105_v18  ;;  %v281_v25 = vld [vmem:[%s394_s0] sm:$0xff]  ;;  %s222_s12 = sshll.u32 %s327_s11, 4  ;;  %s329_s15 = smov 8   ;;  %s223_s12 = int_to_ptr.vmem [resolvable:$true] %s222_s12 }
   0xb   :  { %41 = vst [vmem:[#allocation9] sm:$0xf] %v38_v15  ;;  %v300_v28 = vld [vmem:[%s395_s1] ss:$0 sm:$0xff]  ;;  %s328_s1 = smov 128  }
   0xc   :  { %64 = vst [vmem:[#allocation9 + $0x4] sm:$0xf] %v61_v16  ;;  %197 = vmatpush.bf16.msra.mxu0 %v286_v14  ;;  %291 = vmatpush.bf16.msra.mxu1 %v286_v14 }
   0xd   :  { %87 = vst [vmem:[#allocation9 + $0x8] sm:$0xf] %v84_v19 }
   0xe   :  { %110 = vst [vmem:[#allocation9 + $0xc] sm:$0xf] %v107_v20 }
  0x10   :  { %198 = vmatpush.bf16.msra.mxu0 %v285_v21  ;;  %292 = vmatpush.bf16.msra.mxu1 %v285_v21 }
  0x13   :  { %v279_v26 = vld [vmem:[#allocation9] sm:$0xff] }
  0x14   :  { %199 = vmatpush.bf16.msra.mxu0 %v284_v22  ;;  %293 = vmatpush.bf16.msra.mxu1 %v284_v22 }
  0x15   :  { %v280_v27 = vld [vmem:[#allocation9 + $0x8] sm:$0xff] }
  0x18   :  { %200 = vmatpush.bf16.msra.mxu0 %v283_v23  ;;  %294 = vmatpush.bf16.msra.mxu1 %v283_v23 }
  0x1c   :  { %201 = vmatpush.bf16.msra.mxu0 %v282_v24  ;;  %295 = vmatpush.bf16.msra.mxu1 %v282_v24 }
  0x20   :  { %202 = vmatpush.bf16.msra.mxu0 %v281_v25  ;;  %296 = vmatpush.bf16.msra.mxu1 %v281_v25 }
  0x23   :  { %203 = vmatmul.bf16.vlgmr.msra.gmra.mxu0 %v279_v26  ;;  %208 = vmatmul.bf16.vlgmr.msra.gmra.mxu1 %v280_v27 }
  0xa0   :  { %v204_v29 = vpop.f32.mrf.mxu0  ;;  %v209_v30 = vpop.f32.mrf.mxu1 }
  0xa1   :  { %v205_v31 = vadd.f32 %v300_v28, %v204_v29  ;;  %v210_v32 = vadd.f32 %v300_v28, %v209_v30 }
  0xa3   :  { %214 = vst [vmem:[#allocation7] sm:$0xff] %v205_v31 }
  0xa4   :  { %216 = vst [vmem:[#allocation7 + $0x10] sm:$0xff] %v210_v32 }
  0xa8   :  { %v206_v33 = vpop.f32.mrf.mxu0  ;;  %v211_v34 = vpop.f32.mrf.mxu1 }
  0xa9   :  { %v207_v35 = vadd.f32 %v300_v28, %v206_v33  ;;  %v212_v36 = vadd.f32 %v300_v28, %v211_v34 }
  0xab   :  { %215 = vst [vmem:[#allocation7 + $0x8] sm:$0xff] %v207_v35 }
  0xac   :  { %217 = vst [vmem:[#allocation7 + $0x18] sm:$0xff] %v212_v36 }
  0xad   :  { %230 = dma.vmem_to_hbm [thread:$0]  %s223_s12, 512, %s225_s14, [#allocation8], %s328_s1, %s328_s1, %s329_s15  }
  0xae   :  { %325 = dma.done.wait [#allocation8], 512  }
  0xaf   :  { %326 = vsyncadd [#allocation8], 4294966784 }
  0xb0   :  { %235 = vsyncpa [#allocation8], 1 }

</bundles_post_ra>
